<compile_context>
chip_gen: v5e
topology: v5e:2x2
jax: 0.10.0
libtpu: 0.0.40
codegen_flags: <defaults>
</compile_context>

<pallas_src>
import functools

import jax
import jax.numpy as jnp
from jax.experimental import pallas as pl
from jax.experimental.pallas import tpu as pltpu


def _vq_kernel(z_ref, e_ref, et_ref, esq_ref, zq_ref, sse_ref, *, n_valid):
    """One (D, TN) channel-major tile.

    z_ref  : (D, TN)   input vectors, one column per spatial position (lane-dense)
    e_ref  : (K, D)    codebook
    et_ref : (D, K)    codebook transposed (for the one-hot gather matmul)
    esq_ref: (K, 1)    precomputed ||e_k||^2 (f32)
    zq_ref : (D, TN)   quantized output (lane-dense store)
    sse_ref: (1, 8, 128) per-tile sum((z_q - z)^2), value broadcast over the block
    n_valid: static number of real (non-padded) columns, or None if no padding
    """
    z = z_ref[...]                                   # (D, TN), input dtype
    e = e_ref[...]                                   # (K, D)
    et = et_ref[...]                                 # (D, K)
    esq = esq_ref[...].astype(jnp.float32)           # (K, 1)

    k = e.shape[0]
    tn = z.shape[1]

    # MXU in the input dtype, f32 accumulation:  cross[k, n] = <e_k, z_n>
    cross = jnp.dot(e, z, preferred_element_type=jnp.float32)      # (K, TN)

    # argmin_k ||z_n - e_k||^2 == argmin_k (||e_k||^2 - 2 <e_k, z_n>);
    # the per-column ||z_n||^2 term is a constant w.r.t. k and is dropped.
    d = esq - 2.0 * cross                                           # (K, TN) f32

    # First-occurrence argmin along the codebook (sublane) axis, fully 2-D.
    min_d = jnp.min(d, axis=0, keepdims=True)                       # (1, TN)
    iota = jax.lax.broadcasted_iota(jnp.int32, (k, tn), 0)          # (K, TN)
    first = jnp.min(jnp.where(d == min_d, iota, k),
                    axis=0, keepdims=True)                          # (1, TN)
    one_hot = (iota == first).astype(et.dtype)                      # (K, TN)

    # One-hot gather on the MXU: zq[:, n] = e[first_n, :]
    zq = jnp.dot(et, one_hot, preferred_element_type=jnp.float32)   # (D, TN) f32
    zq_ref[...] = zq.astype(zq_ref.dtype)

    # Per-tile SSE partial (f32), excluding padded tail columns.
    diff = zq - z.astype(jnp.float32)                               # (D, TN)
    sq = diff * diff
    if n_valid is not None:
        col = (pl.program_id(0) * tn
               + jax.lax.broadcasted_iota(jnp.int32, (1, tn), 1))
        sq = sq * (col < n_valid).astype(jnp.float32)
    partial = jnp.sum(sq)
    sse_ref[...] = jnp.broadcast_to(partial, sse_ref.shape)


def _vmem_limit_bytes(d, k, tile_n, itemsize):
    io = 2 * 2 * d * tile_n * itemsize          # z + zq tiles, double buffered
    cb = 2 * (2 * k * d * itemsize + k * 4)     # e, e_t, e_sq (double buffered)
    tmp = 5 * k * tile_n * 4                    # (K, TN) f32/int32 intermediates
    sse = 2 * 8 * 128 * 4
    est = io + cb + tmp + sse
    # Floor at 32 MiB (>= default scoped VMEM everywhere), cap at 48 MiB
    # (safe on v7x's 64 MiB physical VMEM).
    return int(min(max(2 * est, 32 << 20), 48 << 20))


def _vq_channel_major(z_cd, e, e_t, e_sq, tile_n, n_valid):
    """Run the Pallas kernel over the channel-major (D, N_pad) input."""
    d, n_pad = z_cd.shape
    k = e.shape[0]
    num_tiles = n_pad // tile_n

    kernel = functools.partial(
        _vq_kernel, n_valid=None if n_valid == n_pad else n_valid)

    zq_cd, sse_parts = pl.pallas_call(
        kernel,
        out_shape=(
            jax.ShapeDtypeStruct((d, n_pad), z_cd.dtype),
            jax.ShapeDtypeStruct((num_tiles, 8, 128), jnp.float32),
        ),
        grid_spec=pltpu.PrefetchScalarGridSpec(
            num_scalar_prefetch=0,
            grid=(num_tiles,),
            in_specs=[
                pl.BlockSpec((d, tile_n), lambda i: (0, i)),       # z tile
                pl.BlockSpec((k, d), lambda i: (0, 0)),            # codebook
                pl.BlockSpec((d, k), lambda i: (0, 0)),            # codebook^T
                pl.BlockSpec((k, 1), lambda i: (0, 0)),            # ||e||^2
            ],
            out_specs=[
                pl.BlockSpec((d, tile_n), lambda i: (0, i)),       # z_q tile
                pl.BlockSpec((1, 8, 128), lambda i: (i, 0, 0)),    # SSE partials
            ],
        ),
        compiler_params=pltpu.CompilerParams(
            dimension_semantics=("parallel",),
            vmem_limit_bytes=_vmem_limit_bytes(
                d, k, tile_n, jnp.dtype(z_cd.dtype).itemsize),
        ),
    )(z_cd, e, e_t, e_sq)

    sse = jnp.sum(sse_parts[:, 0, 0])
    return zq_cd, sse


@functools.partial(jax.jit, static_argnames=("vq_beta", "tile_n"))
def vector_quantizer_forward(z, codebook, vq_beta, tile_n=512):
    """Forward pass of VectorQuantizer.

    z        : (B, C, H, W)  NCHW, C == vq_dim
    codebook : (vq_size, vq_dim) embedding weight
    Returns (z_q in NCHW, scalar loss) — same forward semantics as the PyTorch module.
    """
    b, c, h, w = z.shape
    n = b * h * w

    # NCHW -> channel-major (C, N): spatial positions on the 128-lane axis so the
    # kernel's loads/stores are lane-dense even when vq_dim << 128.
    z_cd = jnp.transpose(z, (1, 0, 2, 3)).reshape(c, n)

    # Pad the spatial axis up to a multiple of tile_n; padded columns are masked
    # out of the SSE inside the kernel and sliced off afterwards.
    n_pad = pl.cdiv(n, tile_n) * tile_n
    if n_pad != n:
        z_cd = jnp.pad(z_cd, ((0, 0), (0, n_pad - n)))

    e = codebook                                                     # (K, D)
    e_t = codebook.T                                                 # (D, K)
    e_sq = jnp.sum(codebook.astype(jnp.float32) ** 2,
                   axis=1, keepdims=True)                            # (K, 1)

    zq_cd, sse = _vq_channel_major(z_cd, e, e_t, e_sq, tile_n, n)

    # loss = beta * mean((sg(z_q) - z)^2) + mean((z_q - sg(z))^2)
    # Forward value: (1 + beta) * mean((z_q - z)^2).
    loss = (1.0 + vq_beta) * sse / jnp.float32(n * c)

    zq = zq_cd[:, :n].reshape(c, b, h, w)
    zq = jnp.transpose(zq, (1, 0, 2, 3))                             # back to NCHW

    # Straight-through estimator (forward value unchanged).
    # TODO(synk): training-time gradients of the two loss terms need a custom_vjp;
    # only forward values match the PyTorch module here.
    zq = z + jax.lax.stop_gradient(zq - z)
    return zq, loss


if __name__ == "__main__":
    # Small deterministic setup: batch=2, channels(vq_dim)=4, spatial=16x16.
    vq_size = 16
    vq_dim = 4
    vq_beta = 0.25
    B, C, H, W = 2, vq_dim, 16, 16

    key = jax.random.PRNGKey(0)
    k_z, k_e = jax.random.split(key)

    z = jax.random.normal(k_z, (B, C, H, W), dtype=jnp.float32)
    # nn.Embedding weight init: uniform(-1/vq_size, 1/vq_size), shape (K, D)
    codebook = jax.random.uniform(
        k_e, (vq_size, vq_dim), dtype=jnp.float32,
        minval=-1.0 / vq_size, maxval=1.0 / vq_size)

    z_q, loss = vector_quantizer_forward(z, codebook, vq_beta)
    jax.block_until_ready((z_q, loss))

    # Pure-JAX reference (same math as the PyTorch module).
    z_flat_ref = jnp.transpose(z, (0, 2, 3, 1)).reshape(-1, C)
    d_ref = (jnp.sum(z_flat_ref ** 2, axis=1, keepdims=True)
             + jnp.sum(codebook ** 2, axis=1)[None, :]
             - 2.0 * z_flat_ref @ codebook.T)
    idx_ref = jnp.argmin(d_ref, axis=1)
    zq_ref = codebook[idx_ref].reshape(B, H, W, C).transpose(0, 3, 1, 2)
    loss_ref = (1.0 + vq_beta) * jnp.mean((zq_ref - z) ** 2)
    assert jnp.allclose(z_q, zq_ref, atol=1e-5), "z_q mismatch"
    assert jnp.allclose(loss, loss_ref, rtol=1e-5, atol=1e-5), "loss mismatch"

    # Exercise the multi-tile + padded-tail path (N=512, tile_n=384 -> pad to 768).
    z_q2, loss2 = vector_quantizer_forward(z, codebook, vq_beta, tile_n=384)
    jax.block_until_ready((z_q2, loss2))
    assert jnp.allclose(z_q2, zq_ref, atol=1e-5), "z_q mismatch (padded path)"
    assert jnp.allclose(loss2, loss_ref, rtol=1e-5, atol=1e-5), "loss mismatch (padded path)"

    print("KERNEL_OK")
</pallas_src>

<mosaic_0001>
module attributes {stable_mosaic.version = 11 : i64} {
  func.func @_vq_kernel(%arg0: i32, %arg1: memref<4x512xf32, #tpu.memory_space<vmem>>, %arg2: memref<16x4xf32, #tpu.memory_space<vmem>>, %arg3: memref<4x16xf32, #tpu.memory_space<vmem>>, %arg4: memref<16x1xf32, #tpu.memory_space<vmem>>, %arg5: memref<4x512xf32, #tpu.memory_space<vmem>>, %arg6: memref<1x8x128xf32, #tpu.memory_space<vmem>>) attributes {dimension_semantics = [#tpu.dimension_semantics<parallel>], iteration_bounds = array<i64: 1>, scalar_prefetch = 0 : i64, scratch_operands = 0 : i64, tpu.core_type = #tpu.core_type<tc>, window_params = [{transform_indices = @transform_0, window_bounds = array<i64: 4, 512>}, {pipeline_mode = #tpu.pipeline_mode<synchronous>, transform_indices = @transform_1, window_bounds = array<i64: 16, 4>}, {pipeline_mode = #tpu.pipeline_mode<synchronous>, transform_indices = @transform_2, window_bounds = array<i64: 4, 16>}, {pipeline_mode = #tpu.pipeline_mode<synchronous>, transform_indices = @transform_3, window_bounds = array<i64: 16, 1>}, {transform_indices = @transform_4, window_bounds = array<i64: 4, 512>}, {transform_indices = @transform_5, window_bounds = array<i64: 1, 8, 128>}]} {
    %c0 = arith.constant 0 : index
    %c0_0 = arith.constant 0 : index
    %0 = vector.load %arg1[%c0, %c0_0] : memref<4x512xf32, #tpu.memory_space<vmem>>, vector<4x512xf32>
    %c0_1 = arith.constant 0 : index
    %c0_2 = arith.constant 0 : index
    %1 = vector.load %arg2[%c0_1, %c0_2] : memref<16x4xf32, #tpu.memory_space<vmem>>, vector<16x4xf32>
    %c0_3 = arith.constant 0 : index
    %c0_4 = arith.constant 0 : index
    %2 = vector.load %arg3[%c0_3, %c0_4] : memref<4x16xf32, #tpu.memory_space<vmem>>, vector<4x16xf32>
    %c0_5 = arith.constant 0 : index
    %c0_6 = arith.constant 0 : index
    %3 = vector.load %arg4[%c0_5, %c0_6] : memref<16x1xf32, #tpu.memory_space<vmem>>, vector<16x1xf32>
    %cst = arith.constant dense<0.000000e+00> : vector<16x512xf32>
    %4 = tpu.matmul %1, %0, %cst {dimension_numbers = #tpu.dot_dimension_numbers<[1], [0], [0], [1], [0, 0, 1, 1], [], []>} : vector<16x4xf32>, vector<4x512xf32>, vector<16x512xf32> -> vector<16x512xf32>
    %cst_7 = arith.constant 2.000000e+00 : f32
    %5 = vector.broadcast %cst_7 : f32 to vector<16x512xf32>
    %6 = arith.mulf %5, %4 : vector<16x512xf32>
    %7 = vector.broadcast %3 : vector<16x1xf32> to vector<16x512xf32>
    %8 = arith.subf %7, %6 : vector<16x512xf32>
    %cst_8 = arith.constant dense<0x7F800000> : vector<512xf32>
    %9 = vector.multi_reduction <minimumf>, %8, %cst_8 [0] : vector<16x512xf32> to vector<512xf32>
    %10 = vector.shape_cast %9 : vector<512xf32> to vector<1x512xf32>
    %11 = tpu.iota {dimensions = array<i32: 0>} : vector<16x512xi32>
    %12 = vector.broadcast %10 : vector<1x512xf32> to vector<16x512xf32>
    %13 = arith.cmpf oeq, %8, %12 : vector<16x512xf32>
    %c16_i32 = arith.constant 16 : i32
    %14 = vector.broadcast %c16_i32 : i32 to vector<16x512xi32>
    %15 = arith.select %13, %11, %14 : vector<16x512xi1>, vector<16x512xi32>
    %cst_9 = arith.constant dense<2147483647> : vector<512xi32>
    %16 = vector.multi_reduction <minsi>, %15, %cst_9 [0] : vector<16x512xi32> to vector<512xi32>
    %17 = vector.shape_cast %16 : vector<512xi32> to vector<1x512xi32>
    %18 = vector.broadcast %17 : vector<1x512xi32> to vector<16x512xi32>
    %19 = arith.cmpi eq, %11, %18 : vector<16x512xi32>
    %20 = arith.extui %19 : vector<16x512xi1> to vector<16x512xi32>
    %21 = arith.sitofp %20 : vector<16x512xi32> to vector<16x512xf32>
    %cst_10 = arith.constant dense<0.000000e+00> : vector<4x512xf32>
    %22 = tpu.matmul %2, %21, %cst_10 {dimension_numbers = #tpu.dot_dimension_numbers<[1], [0], [0], [1], [0, 0, 1, 1], [], []>} : vector<4x16xf32>, vector<16x512xf32>, vector<4x512xf32> -> vector<4x512xf32>
    %c0_11 = arith.constant 0 : index
    %c0_12 = arith.constant 0 : index
    %23 = vector.load %arg5[%c0_11, %c0_12] : memref<4x512xf32, #tpu.memory_space<vmem>>, vector<4x512xf32>
    tpu.vector_store %arg5[%c0_11, %c0_12], %22 {strides = array<i32>} : memref<4x512xf32, #tpu.memory_space<vmem>>, vector<4x512xf32>,
    %24 = arith.subf %22, %0 : vector<4x512xf32>
    %25 = arith.mulf %24, %24 : vector<4x512xf32>
    %26 = vector.shape_cast %25 : vector<4x512xf32> to vector<1x4x512xf32>
    %cst_13 = arith.constant dense<0.000000e+00> : vector<1xf32>
    %27 = vector.multi_reduction <add>, %26, %cst_13 [1, 2] : vector<1x4x512xf32> to vector<1xf32>
    %28 = vector.shape_cast %27 : vector<1xf32> to vector<1x1x1xf32>
    %29 = vector.extract %28[0, 0, 0] : f32 from vector<1x1x1xf32>
    %30 = vector.broadcast %29 : f32 to vector<1x8x128xf32>
    %c0_14 = arith.constant 0 : index
    %c0_15 = arith.constant 0 : index
    %c0_16 = arith.constant 0 : index
    %31 = vector.load %arg6[%c0_14, %c0_15, %c0_16] : memref<1x8x128xf32, #tpu.memory_space<vmem>>, vector<1x8x128xf32>
    tpu.vector_store %arg6[%c0_14, %c0_15, %c0_16], %30 {strides = array<i32>} : memref<1x8x128xf32, #tpu.memory_space<vmem>>, vector<1x8x128xf32>,
    return
  }
  func.func @transform_0(%arg0: i32) -> (i32, i32) {
    %c0_i32 = arith.constant 0 : i32
    %c0_i32_0 = arith.constant 0 : i32
    return %c0_i32, %arg0 : i32, i32
  }
  func.func @transform_1(%arg0: i32) -> (i32, i32) {
    %c0_i32 = arith.constant 0 : i32
    %c0_i32_0 = arith.constant 0 : i32
    %c0_i32_1 = arith.constant 0 : i32
    return %c0_i32, %c0_i32_0 : i32, i32
  }
  func.func @transform_2(%arg0: i32) -> (i32, i32) {
    %c0_i32 = arith.constant 0 : i32
    %c0_i32_0 = arith.constant 0 : i32
    %c0_i32_1 = arith.constant 0 : i32
    return %c0_i32, %c0_i32_0 : i32, i32
  }
  func.func @transform_3(%arg0: i32) -> (i32, i32) {
    %c0_i32 = arith.constant 0 : i32
    %c0_i32_0 = arith.constant 0 : i32
    %c0_i32_1 = arith.constant 0 : i32
    return %c0_i32, %c0_i32_0 : i32, i32
  }
  func.func @transform_4(%arg0: i32) -> (i32, i32) {
    %c0_i32 = arith.constant 0 : i32
    %c0_i32_0 = arith.constant 0 : i32
    return %c0_i32, %arg0 : i32, i32
  }
  func.func @transform_5(%arg0: i32) -> (i32, i32, i32) {
    %c0_i32 = arith.constant 0 : i32
    %c0_i32_0 = arith.constant 0 : i32
    %c0_i32_1 = arith.constant 0 : i32
    return %arg0, %c0_i32, %c0_i32_0 : i32, i32, i32
  }
}

</mosaic_0001>

<bundles_post_ra>
// kernel: vector_quantizer_forward.1
= control target key start
LH: loop header
LB: loop body
LE: loop exit
PB: predicated region body
PF: predicated region fallthrough
CT: control target
= control target key end

     0   :  { %v462_v2 = vmov 0   ;;  %vm42_vm0 = vcmask 1043456   ;;  %vm35_vm1 = vcmask 31744   ;;  %v197_v35 = vlaneseq  ;;  %s567_s0 = inlined_call_operand.vmem [shape: f32[4,512], index: 0, kind: input, shape index: {}]   ;;  %s568_s3 = inlined_call_operand.vmem [shape: f32[16,1], index: 3, kind: input, shape index: {}]   ;;  %s569_s1 = inlined_call_operand.vmem [shape: f32[16,4], index: 1, kind: input, shape index: {}]   ;;  %s570_s2 = inlined_call_operand.vmem [shape: f32[4,16], index: 2, kind: input, shape index: {}]   ;;  %s571_s4 = inlined_call_operand.vmem [shape: f32[4,512], index: 4, kind: output, shape index: {0}]   ;;  %s572_s5 = inlined_call_operand.vmem [shape: f32[1,8,128], index: 5, kind: output, shape index: {1}]  }
   0x1   :  { %v19_v0 = vld [vmem:[%s567_s0] sm:$0xff]  ;;  %v20_v1 = vld [vmem:[%s567_s0 + $0x8] sm:$0xff]  ;;  %461 = vset.pattern.permute.xlu0 %v462_v2 }
   0x2   :  { %28 = vst [vmem:[#allocation1] ss:$2 sm:$0xff] %v19_v0  ;;  %v24_v3 = vld [vmem:[%s568_s3] sm:$0xff]  ;;  %v25_v9 = vld [vmem:[%s568_s3 + $0x8] sm:$0xff]  ;;  %v524_v46 = vshrl.u32 %v197_v35, 7 }
   0x3   :  { %30 = vst [vmem:[#allocation1 + $0x10] ss:$2 sm:$0xff] %v20_v1  ;;  %153 = vperm.xlu0 %461, %v24_v3   ;;  %v21_v4 = vld [vmem:[%s569_s1] sm:$0xff]  ;;  %v22_v10 = vld [vmem:[%s569_s1 + $0x8] sm:$0xff] }
   0x4   :  { %v527_v55 = vadd.s32 8, %v524_v46 }
   0x9   :  { %v31_v5 = vld.sshfl [vmem:[#allocation1] sm:$0xff pattern:$0x75316420]  ;;  %v32_v6 = vld.sshfl [vmem:[#allocation1 + $0x8] sm:$0xff pattern:$0x75316420] }
   0xa   :  { %425 = vmatpush.msk.msra.mxu0 %vm42_vm0, %v31_v5  ;;  %428 = vmatpush.msk.msra.mxu1 %vm42_vm0, %v32_v6  ;;  %380 = vst [vmem:[#allocation1] ss:$2 sm:$0xff] %v19_v0  ;;  %v33_v7 = vld.sshfl [vmem:[#allocation1 + $0x10] sm:$0xff pattern:$0x75316420] }
   0xb   :  { %431 = vmatpush.msk.msra.mxu2 %vm42_vm0, %v33_v7  ;;  %v34_v8 = vld.sshfl [vmem:[#allocation1 + $0x18] sm:$0xff pattern:$0x75316420]  ;;  %426 = vmatmul.msk.f32.vlgmr.msra.gmra.mxu0 %vm35_vm1, %v21_v4 }
   0xc   :  { %434 = vmatpush.msk.msra.mxu3 %vm42_vm0, %v34_v8  ;;  %382 = vst [vmem:[#allocation1 + $0x10] ss:$2 sm:$0xff] %v20_v1  ;;  %429 = vmatmul.msk.f32.vlgmr.msra.gmra.mxu1 %vm35_vm1, %v21_v4 }
   0xd   :  { %432 = vmatmul.msk.f32.vlgmr.msra.gmra.mxu2 %vm35_vm1, %v21_v4  ;;  %435 = vmatmul.msk.f32.vlgmr.msra.gmra.mxu3 %vm35_vm1, %v21_v4 }
   0xe   :  { %158 = vperm.xlu0 %461, %v25_v9  }
  0x13   :  { %427 = vmatmul.msk.f32.gmra.mxu0 %vm35_vm1, %v22_v10 }
  0x14   :  { %430 = vmatmul.msk.f32.gmra.mxu1 %vm35_vm1, %v22_v10 }
  0x15   :  { %433 = vmatmul.msk.f32.gmra.mxu2 %vm35_vm1, %v22_v10  ;;  %436 = vmatmul.msk.f32.gmra.mxu3 %vm35_vm1, %v22_v10 }
  0x75   :  { %v154_v12 = vpop.permute.xlu0 %153 }
  0x80   :  { %v159_v22 = vpop.permute.xlu0 %158 }
  0x88   :  { %v68_v11 = vpop.f32.mrf.mxu0 }
  0x89   :  { %v91_v13 = vpop.f32.mrf.mxu1  ;;  %v143_v14 = vmul.f32 2.0, %v68_v11 }
  0x8a   :  { %v144_v15 = vmul.f32 2.0, %v91_v13 }
  0x8b   :  { %v161_v23 = vsub.f32 %v154_v12, %v143_v14 }
  0x8c   :  { %v162_v24 = vsub.f32 %v154_v12, %v144_v15 }
  0x90   :  { %v114_v16 = vpop.f32.mrf.mxu2  ;;  %v137_v17 = vpop.f32.mrf.mxu3 }
  0x91   :  { %v71_v18 = vpop.f32.mrf.mxu0  ;;  %v94_v19 = vpop.f32.mrf.mxu1  ;;  %v145_v29 = vmul.f32 2.0, %v114_v16  ;;  %v146_v30 = vmul.f32 2.0, %v137_v17 }
  0x92   :  { %v147_v20 = vmul.f32 2.0, %v71_v18  ;;  %v148_v21 = vmul.f32 2.0, %v94_v19 }
  0x93   :  { %v163_v40 = vsub.f32 %v154_v12, %v145_v29  ;;  %v164_v41 = vsub.f32 %v154_v12, %v146_v30 }
  0x94   :  { %v165_v25 = vsub.f32 %v159_v22, %v147_v20  ;;  %v166_v26 = vsub.f32 %v159_v22, %v148_v21 }
  0x96   :  { %v169_v27 = vmin.f32 %v161_v23, %v165_v25  ;;  %v176_v28 = vmin.f32 %v162_v24, %v166_v26 }
  0x98   :  { %v170_v31 = vrot.slane %v169_v27, 4  ;;  %v177_v32 = vrot.slane %v176_v28, 4  ;;  %v117_v33 = vpop.f32.mrf.mxu2  ;;  %v140_v34 = vpop.f32.mrf.mxu3 }
  0x99   :  { %v149_v36 = vmul.f32 2.0, %v117_v33  ;;  %v150_v37 = vmul.f32 2.0, %v140_v34  ;;  %v463_v34 = vmov 1.0  }
  0x9a   :  { %v171_v38 = vmin.f32 %v169_v27, %v170_v31  ;;  %v178_v39 = vmin.f32 %v176_v28, %v177_v32 }
  0x9b   :  { %v167_v42 = vsub.f32 %v159_v22, %v149_v36  ;;  %v168_v43 = vsub.f32 %v159_v22, %v150_v37 }
  0x9c   :  { %v172_v44 = vrot.slane %v171_v38, 2  ;;  %v179_v45 = vrot.slane %v178_v39, 2 }
  0x9d   :  { %v183_v47 = vmin.f32 %v163_v40, %v167_v42  ;;  %v190_v48 = vmin.f32 %v164_v41, %v168_v43 }
  0x9e   :  { %v173_v49 = vmin.f32 %v171_v38, %v172_v44  ;;  %v180_v50 = vmin.f32 %v178_v39, %v179_v45  ;;  %v23_v39 = vld [vmem:[%s570_s2] sm:$0xf] }
  0x9f   :  { %v184_v51 = vrot.slane %v183_v47, 4  ;;  %v191_v52 = vrot.slane %v190_v48, 4 }
  0xa0   :  { %v174_v53 = vrot.slane %v173_v49, 1  ;;  %v181_v54 = vrot.slane %v180_v50, 1 }
  0xa1   :  { %v185_v56 = vmin.f32 %v183_v47, %v184_v51  ;;  %v192_v57 = vmin.f32 %v190_v48, %v191_v52  ;;  %v384_v47 = vld.sshfl [vmem:[#allocation1 + $0x8] sm:$0xff pattern:$0x75316420]  ;;  %v385_v52 = vld.sshfl [vmem:[#allocation1 + $0x10] sm:$0xff pattern:$0x75316420] }
  0xa2   :  { %v175_v58 = vmin.f32 %v173_v49, %v174_v53  ;;  %v182_v59 = vmin.f32 %v180_v50, %v181_v54  ;;  %v386_v53 = vld.sshfl [vmem:[#allocation1 + $0x18] sm:$0xff pattern:$0x75316420] }
  0xa3   :  { %v186_v60 = vrot.slane %v185_v56, 2  ;;  %v193_v61 = vrot.slane %v192_v57, 2 }
  0xa4   :  { %vm200_vm2 = vcmp.eq.f32.partialorder %v161_v23, %v175_v58  ;;  %vm204_vm3 = vcmp.eq.f32.partialorder %v165_v25, %v175_v58  ;;  %vm201_vm4 = vcmp.eq.f32.partialorder %v162_v24, %v182_v59  ;;  %vm205_vm5 = vcmp.eq.f32.partialorder %v166_v26, %v182_v59 }
  0xa5   :  { %v208_v62 = vsel %vm200_vm2, %v524_v46, 16  ;;  %v212_v63 = vsel %vm204_vm3, %v527_v55, 16  ;;  %v209_v0 = vsel %vm201_vm4, %v524_v46, 16  ;;  %v213_v1 = vsel %vm205_vm5, %v527_v55, 16 }
  0xa6   :  { %vm216_vm6 = vcmp.lt.s32.totalorder %v208_v62, %v212_v63  ;;  %vm227_vm7 = vcmp.lt.s32.totalorder %v209_v0, %v213_v1  ;;  %v187_v2 = vmin.f32 %v185_v56, %v186_v60  ;;  %v194_v3 = vmin.f32 %v192_v57, %v193_v61 }
  0xa7   :  { %v217_v4 = vsel %vm216_vm6, %v208_v62, %v212_v63  ;;  %v228_v5 = vsel %vm227_vm7, %v209_v0, %v213_v1 }
  0xa8   :  { %v218_v6 = vrot.slane %v217_v4, 4  ;;  %v229_v7 = vrot.slane %v228_v5, 4  ;;  %v188_v8 = vrot.slane %v187_v2, 1  ;;  %v195_v9 = vrot.slane %v194_v3, 1 }
  0xaa   :  { %v189_v10 = vmin.f32 %v187_v2, %v188_v8  ;;  %v196_v11 = vmin.f32 %v194_v3, %v195_v9  ;;  %vm219_vm8 = vcmp.lt.s32.totalorder %v217_v4, %v218_v6  ;;  %vm230_vm9 = vcmp.lt.s32.totalorder %v228_v5, %v229_v7 }
  0xab   :  { %v220_v12 = vsel %vm219_vm8, %v217_v4, %v218_v6  ;;  %v231_v13 = vsel %vm230_vm9, %v228_v5, %v229_v7 }
  0xac   :  { %vm202_vm10 = vcmp.eq.f32.partialorder %v163_v40, %v189_v10  ;;  %vm206_vm11 = vcmp.eq.f32.partialorder %v167_v42, %v189_v10  ;;  %vm203_vm12 = vcmp.eq.f32.partialorder %v164_v41, %v196_v11  ;;  %vm207_vm13 = vcmp.eq.f32.partialorder %v168_v43, %v196_v11  ;;  %v383_v43 = vld.sshfl [vmem:[#allocation1] sm:$0xff pattern:$0x75316420] }
  0xad   :  { %v210_v14 = vsel %vm202_vm10, %v524_v46, 16  ;;  %v214_v15 = vsel %vm206_vm11, %v527_v55, 16  ;;  %v211_v16 = vsel %vm203_vm12, %v524_v46, 16  ;;  %v215_v17 = vsel %vm207_vm13, %v527_v55, 16 }
  0xae   :  { %vm238_vm14 = vcmp.lt.s32.totalorder %v210_v14, %v214_v15  ;;  %vm249_vm15 = vcmp.lt.s32.totalorder %v211_v16, %v215_v17  ;;  %v221_v18 = vrot.slane %v220_v12, 2  ;;  %v232_v19 = vrot.slane %v231_v13, 2 }
  0xaf   :  { %v239_v20 = vsel %vm238_vm14, %v210_v14, %v214_v15  ;;  %v250_v21 = vsel %vm249_vm15, %v211_v16, %v215_v17  ;;  %vm284_vm13 = vcmask 130048  }
  0xb0   :  { %v240_v22 = vrot.slane %v239_v20, 4  ;;  %v251_v23 = vrot.slane %v250_v21, 4  ;;  %vm222_vm1 = vcmp.lt.s32.totalorder %v220_v12, %v221_v18  ;;  %vm233_vm2 = vcmp.lt.s32.totalorder %v231_v13, %v232_v19 }
  0xb1   :  { %v223_v24 = vsel %vm222_vm1, %v220_v12, %v221_v18  ;;  %v234_v25 = vsel %vm233_vm2, %v231_v13, %v232_v19 }
  0xb2   :  { %v224_v26 = vrot.slane %v223_v24, 1  ;;  %v235_v27 = vrot.slane %v234_v25, 1  ;;  %vm241_vm3 = vcmp.lt.s32.totalorder %v239_v20, %v240_v22  ;;  %vm252_vm4 = vcmp.lt.s32.totalorder %v250_v21, %v251_v23 }
  0xb3   :  { %v242_v28 = vsel %vm241_vm3, %v239_v20, %v240_v22  ;;  %v253_v29 = vsel %vm252_vm4, %v250_v21, %v251_v23 }
  0xb4   :  { %vm225_vm5 = vcmp.lt.s32.totalorder %v223_v24, %v224_v26  ;;  %vm236_vm6 = vcmp.lt.s32.totalorder %v234_v25, %v235_v27  ;;  %v243_v30 = vrot.slane %v242_v28, 2  ;;  %v254_v31 = vrot.slane %v253_v29, 2 }
  0xb5   :  { %v226_v32 = vsel %vm225_vm5, %v223_v24, %v224_v26  ;;  %v237_v33 = vsel %vm236_vm6, %v234_v25, %v235_v27 }
  0xb6   :  { %vm264_vm7 = vcmp.eq.s32.totalorder %v527_v55, %v226_v32  ;;  %vm265_vm8 = vcmp.eq.s32.totalorder %v527_v55, %v237_v33  ;;  %vm244_vm9 = vcmp.lt.s32.totalorder %v242_v28, %v243_v30  ;;  %vm255_vm10 = vcmp.lt.s32.totalorder %v253_v29, %v254_v31 }
  0xb7   :  { %445 = vmatpush.msk.msrb.mxu0 %vm264_vm7, %v463_v34  ;;  %448 = vmatpush.msk.msrb.mxu1 %vm265_vm8, %v463_v34  ;;  %vm260_vm11 = vcmp.eq.s32.totalorder %v524_v46, %v226_v32  ;;  %vm261_vm12 = vcmp.eq.s32.totalorder %v524_v46, %v237_v33  ;;  %v245_v35 = vsel %vm244_vm9, %v242_v28, %v243_v30 }
  0xb8   :  { %v256_v36 = vsel %vm255_vm10, %v253_v29, %v254_v31  ;;  %v246_v37 = vrot.slane %v245_v35, 1 }
  0xb9   :  { %446 = vmatpush.msk.msrb.mxu0 %vm260_vm11, %v463_v34  ;;  %449 = vmatpush.msk.msrb.mxu1 %vm261_vm12, %v463_v34  ;;  %v257_v38 = vrot.slane %v256_v36, 1 }
  0xba   :  { %447 = vmatmul.msk.f32.vlgmr.msrb.gmra.mxu0 %vm284_vm13, %v23_v39  ;;  %450 = vmatmul.msk.f32.vlgmr.msrb.gmra.mxu1 %vm284_vm13, %v23_v39  ;;  %vm247_vm14 = vcmp.lt.s32.totalorder %v245_v35, %v246_v37 }
  0xbb   :  { %vm258_vm15 = vcmp.lt.s32.totalorder %v256_v36, %v257_v38  ;;  %v248_v40 = vsel %vm247_vm14, %v245_v35, %v246_v37 }
  0xbc   :  { %v259_v41 = vsel %vm258_vm15, %v256_v36, %v257_v38  ;;  %vm266_vm1 = vcmp.eq.s32.totalorder %v527_v55, %v248_v40  ;;  %vm262_vm3 = vcmp.eq.s32.totalorder %v524_v46, %v248_v40 }
  0xbd   :  { %vm267_vm2 = vcmp.eq.s32.totalorder %v527_v55, %v259_v41  ;;  %451 = vmatpush.msk.msrb.mxu2 %vm266_vm1, %v463_v34  ;;  %vm263_vm4 = vcmp.eq.s32.totalorder %v524_v46, %v259_v41 }
  0xbe   :  { %454 = vmatpush.msk.msrb.mxu3 %vm267_vm2, %v463_v34 }
  0xbf   :  { %452 = vmatpush.msk.msrb.mxu2 %vm262_vm3, %v463_v34 }
  0xc0   :  { %455 = vmatpush.msk.msrb.mxu3 %vm263_vm4, %v463_v34  ;;  %453 = vmatmul.msk.f32.vlgmr.msrb.gmra.mxu2 %vm284_vm13, %v23_v39 }
  0xc1   :  { %456 = vmatmul.msk.f32.vlgmr.msrb.gmra.mxu3 %vm284_vm13, %v23_v39 }
 0x137   :  { %v305_v42 = vpop.f32.mrf.mxu0  ;;  %v325_v44 = vpop.f32.mrf.mxu1 }
 0x138   :  { %v372_v45 = vrot.slane %v325_v44, 4  ;;  %v391_v49 = vsub.f32 %v305_v42, %v383_v43  ;;  %v392_v50 = vsub.f32 %v325_v44, %v384_v47 }
 0x13a   :  { %v374_v48 = vsel %vm42_vm0, %v305_v42, %v372_v45  ;;  %v395_v46 = vmul.f32 %v391_v49, %v391_v49  ;;  %v396_v51 = vmul.f32 %v392_v50, %v392_v50 }
 0x13b   :  { %378 = vst [vmem:[%s571_s4] sm:$0xff] %v374_v48 }
 0x13c   :  { %v399_v54 = vsel %vm42_vm0, %v395_v46, 0.0  ;;  %v400_v55 = vsel %vm42_vm0, %v396_v51, 0.0 }
 0x13d   :  { %v401_v61 = vadd.f32 %v400_v55, %v399_v54 }
 0x143   :  { %v345_v56 = vpop.f32.mrf.mxu2 }
 0x144   :  { %v365_v57 = vpop.f32.mrf.mxu3  ;;  %v393_v58 = vsub.f32 %v345_v56, %v385_v52 }
 0x145   :  { %v373_v59 = vrot.slane %v365_v57, 4  ;;  %v394_v60 = vsub.f32 %v365_v57, %v386_v53 }
 0x146   :  { %v397_v62 = vmul.f32 %v393_v58, %v393_v58 }
 0x147   :  { %v375_v63 = vsel %vm42_vm0, %v345_v56, %v373_v59  ;;  %v398_v0 = vmul.f32 %v394_v60, %v394_v60 }
 0x148   :  { %379 = vst [vmem:[%s571_s4 + $0x8] sm:$0xff] %v375_v63  ;;  %v402_v1 = vsel %vm42_vm0, %v397_v62, 0.0 }
 0x149   :  { %v404_v2 = vsel %vm42_vm0, %v398_v0, 0.0  ;;  %v403_v3 = vadd.f32 %v402_v1, %v401_v61 }
 0x14b   :  { %v405_v4 = vadd.f32 %v404_v2, %v403_v3 }
 0x14d   :  { %406 = vadd.xlane.f32.xlu1 %v405_v4 }
 0x1c0   :  { %v407_v5 = vpop.xlane.xlu1 %406 }
 0x1c1   :  { %v408_v6 = vrot.slane %v407_v5, 4 }
 0x1c3   :  { %v409_v7 = vadd.f32 %v408_v6, %v407_v5 }
 0x1c5   :  { %v410_v8 = vrot.slane %v409_v7, 2 }
 0x1c7   :  { %v411_v9 = vadd.f32 %v410_v8, %v409_v7 }
 0x1c9   :  { %v412_v10 = vrot.slane %v411_v9, 1 }
 0x1cb   :  { %v413_v11 = vadd.f32 %v412_v10, %v411_v9 }
 0x1cd   :  { %457 = vpush %v413_v11 }
 0x1fe   :  { %s458_s7 = spop %457 }
 0x1ff   :  { %v415_v12 = vstv %s458_s7 }
 0x200   :  { %416 = vst [vmem:[%s572_s5] sm:$0xff] %v415_v12 }

</bundles_post_ra>
